<compile_context>
chip_gen: v5e
topology: v5e:2x2
jax: 0.10.0
libtpu: 0.0.40
codegen_flags: <defaults>
</compile_context>

<pallas_src>
import jax
import jax.numpy as jnp
from jax.experimental import pallas as pl
from jax.experimental.pallas import tpu as pltpu


def _logreg_kernel(x_ref, w_ref, b_ref, o_ref, acc_ref):
    # x_ref:   (TB, TK)  input tile (VMEM)
    # w_ref:   (1, TK)   nn.Linear weight slice, resident across batch steps (VMEM)
    # b_ref:   (1, 1)    scalar bias (SMEM)
    # o_ref:   (1, TB)   lane-dense output tile (VMEM)
    # acc_ref: (1, TB)   f32 accumulator scratch (VMEM)
    k = pl.program_id(1)

    @pl.when(k == 0)
    def _():
        acc_ref[...] = jnp.zeros_like(acc_ref)

    # Contract the K dim of w with the K dim of x -> (1, TB); f32 MXU accumulation,
    # no materialized transpose of the x tile.
    acc_ref[...] += jax.lax.dot_general(
        w_ref[...], x_ref[...],
        dimension_numbers=(((1,), (1,)), ((), ())),
        preferred_element_type=jnp.float32,
    )

    @pl.when(k == pl.num_programs(1) - 1)
    def _():
        z = acc_ref[...] + b_ref[0, 0]
        # Exact sigmoid: the EUP epilogue is hidden under the tile DMA anyway.
        o_ref[...] = jax.nn.sigmoid(z).astype(o_ref.dtype)


def _pick_tiles(batch, input_size, itemsize):
    """Layout-legal (batch_tile, k_tile) keeping in-flight VMEM buffers bounded."""
    # Feature (reduction) tile: full D when small or not 128-aligned (full-dim
    # blocks are always legal); otherwise a multiple of 128 capped at 2048.
    if input_size <= 2048 or input_size % 128 != 0:
        tk = input_size
    else:
        tk = 2048

    # Batch tile: full B when small; otherwise a multiple of 128 sized so one
    # x buffer is ~8 MiB (2 in-flight buffers + resident weight + (1,TB) blocks
    # stay well under the explicit 48 MiB vmem_limit_bytes on all generations).
    if batch <= 1024:
        tb = batch
    else:
        budget_bytes = 8 * 1024 * 1024
        tb = budget_bytes // max(1, tk * itemsize)
        tb = max(128, min(4096, (tb // 128) * 128))
        tb = min(tb, (batch // 128) * 128)    # round DOWN: never exceed B
    return tb, tk


def encrypted_logistic_regression(x, weight, bias, *, batch_tile=None, k_tile=None):
    """x: (B, D), weight: (1, D), bias: (1,) -> (B, 1) = sigmoid(x @ W.T + b)."""
    B, D = x.shape
    assert weight.shape == (1, D)
    assert bias.shape == (1,)

    itemsize = x.dtype.itemsize
    tb_auto, tk_auto = _pick_tiles(B, D, itemsize)
    tb = batch_tile if batch_tile is not None else tb_auto
    tk = k_tile if k_tile is not None else tk_auto
    grid = (pl.cdiv(B, tb), pl.cdiv(D, tk))

    bias2d = bias.reshape(1, 1).astype(jnp.float32)
    # Keep kernel inputs a single dtype (tiny cast; if x is bf16 the weight is
    # truncated to bf16 -- accumulation stays f32 on the MXU).
    weight = weight.astype(x.dtype)

    cost = pl.CostEstimate(
        flops=2 * B * D,
        transcendentals=B,
        bytes_accessed=(B * D + D) * itemsize + B * itemsize,
    )

    out_row = pl.pallas_call(
        _logreg_kernel,
        out_shape=jax.ShapeDtypeStruct((1, B), x.dtype),
        grid_spec=pltpu.PrefetchScalarGridSpec(
            num_scalar_prefetch=0,
            grid=grid,
            in_specs=[
                pl.BlockSpec((tb, tk), lambda i, k: (i, k)),          # x tile
                pl.BlockSpec((1, tk), lambda i, k: (0, k)),           # weight slice
                pl.BlockSpec((1, 1), lambda i, k: (0, 0),
                             memory_space=pltpu.SMEM),                # bias scalar
            ],
            out_specs=pl.BlockSpec((1, tb), lambda i, k: (0, i)),     # lane-dense out
            scratch_shapes=[pltpu.VMEM((1, tb), jnp.float32)],        # accumulator
        ),
        compiler_params=pltpu.CompilerParams(
            dimension_semantics=("parallel", "arbitrary"),
            vmem_limit_bytes=48 * 1024 * 1024,
        ),
        cost_estimate=cost,
    )(x, weight, bias2d)

    # Free layout plumbing back to the PyTorch (B, 1) convention.
    return out_row.reshape(B, 1)


if __name__ == "__main__":
    # Small but multi-tile example: batch=256, input_size=64, batch tile 128
    # -> grid (2, 1): exercises the pipelined, lane-dense, accumulator path.
    batch, input_size = 256, 64
    key = jax.random.PRNGKey(0)
    kx, kw, kb = jax.random.split(key, 3)

    x = jax.random.normal(kx, (batch, input_size), dtype=jnp.float32)
    # Deterministic parameter init mimicking nn.Linear(input_size, 1) shapes.
    bound = 1.0 / jnp.sqrt(input_size)
    weight = jax.random.uniform(kw, (1, input_size), dtype=jnp.float32,
                                minval=-bound, maxval=bound)
    bias = jax.random.uniform(kb, (1,), dtype=jnp.float32,
                              minval=-bound, maxval=bound)

    out = encrypted_logistic_regression(x, weight, bias, batch_tile=128)
    out = jax.block_until_ready(out)

    # Sanity check against pure-JAX reference (exact sigmoid -> tight tolerance).
    ref = jax.nn.sigmoid(x @ weight.T + bias)
    assert out.shape == (batch, 1)
    err = float(jnp.max(jnp.abs(out - ref)))
    assert jnp.allclose(out, ref, atol=1e-4, rtol=1e-4), err

    print("KERNEL_OK")
</pallas_src>

<mosaic_0001>
module attributes {stable_mosaic.version = 11 : i64} {
  func.func @_logreg_kernel(%arg0: i32, %arg1: i32, %arg2: memref<128x64xf32, #tpu.memory_space<vmem>>, %arg3: memref<1x64xf32, #tpu.memory_space<vmem>>, %arg4: memref<1x1xf32, #tpu.memory_space<smem>>, %arg5: memref<1x128xf32, #tpu.memory_space<vmem>>, %arg6: memref<1x128xf32, #tpu.memory_space<vmem>>) attributes {dimension_semantics = [#tpu.dimension_semantics<parallel>, #tpu.dimension_semantics<arbitrary>], iteration_bounds = array<i64: 2, 1>, scalar_prefetch = 0 : i64, scratch_operands = 1 : i64, tpu.core_type = #tpu.core_type<tc>, window_params = [{transform_indices = @transform_0, window_bounds = array<i64: 128, 64>}, {transform_indices = @transform_1, window_bounds = array<i64: 1, 64>}, {transform_indices = @transform_2, window_bounds = array<i64: 1, 1>}, {transform_indices = @transform_3, window_bounds = array<i64: 1, 128>}]} {
    %c0_i32 = arith.constant 0 : i32
    %0 = arith.cmpi eq, %arg1, %c0_i32 : i32
    %1 = arith.extui %0 : i1 to i32
    %c0_i32_0 = arith.constant 0 : i32
    %2 = arith.cmpi ne, %1, %c0_i32_0 : i32
    scf.if %2 {
      %cst_10 = arith.constant 0.000000e+00 : f32
      %12 = vector.broadcast %cst_10 : f32 to vector<1x128xf32>
      %c0_11 = arith.constant 0 : index
      %c0_12 = arith.constant 0 : index
      %13 = vector.load %arg6[%c0_11, %c0_12] : memref<1x128xf32, #tpu.memory_space<vmem>>, vector<1x128xf32>
      tpu.vector_store %arg6[%c0_11, %c0_12], %12 {strides = array<i32>} : memref<1x128xf32, #tpu.memory_space<vmem>>, vector<1x128xf32>,
    } else {
    }
    %c0 = arith.constant 0 : index
    %c0_1 = arith.constant 0 : index
    %3 = vector.load %arg6[%c0, %c0_1] : memref<1x128xf32, #tpu.memory_space<vmem>>, vector<1x128xf32>
    %c0_2 = arith.constant 0 : index
    %c0_3 = arith.constant 0 : index
    %4 = vector.load %arg3[%c0_2, %c0_3] : memref<1x64xf32, #tpu.memory_space<vmem>>, vector<1x64xf32>
    %c0_4 = arith.constant 0 : index
    %c0_5 = arith.constant 0 : index
    %5 = vector.load %arg2[%c0_4, %c0_5] : memref<128x64xf32, #tpu.memory_space<vmem>>, vector<128x64xf32>
    %cst = arith.constant dense<0.000000e+00> : vector<1x128xf32>
    %6 = tpu.matmul %4, %5, %cst {dimension_numbers = #tpu.dot_dimension_numbers<[1], [1], [0], [0], [0, 0, 1, 0], [], []>} : vector<1x64xf32>, vector<128x64xf32>, vector<1x128xf32> -> vector<1x128xf32>
    %7 = arith.addf %3, %6 : vector<1x128xf32>
    %c0_6 = arith.constant 0 : index
    %c0_7 = arith.constant 0 : index
    %8 = vector.load %arg6[%c0_6, %c0_7] : memref<1x128xf32, #tpu.memory_space<vmem>>, vector<1x128xf32>
    tpu.vector_store %arg6[%c0_6, %c0_7], %7 {strides = array<i32>} : memref<1x128xf32, #tpu.memory_space<vmem>>, vector<1x128xf32>,
    %c0_i32_8 = arith.constant 0 : i32
    %9 = arith.cmpi eq, %arg1, %c0_i32_8 : i32
    %10 = arith.extui %9 : i1 to i32
    %c0_i32_9 = arith.constant 0 : i32
    %11 = arith.cmpi ne, %10, %c0_i32_9 : i32
    scf.if %11 {
      %c0_10 = arith.constant 0 : index
      %c0_11 = arith.constant 0 : index
      %12 = vector.load %arg6[%c0_10, %c0_11] : memref<1x128xf32, #tpu.memory_space<vmem>>, vector<1x128xf32>
      %c0_12 = arith.constant 0 : index
      %c0_13 = arith.constant 0 : index
      %13 = memref.load %arg4[%c0_12, %c0_13] : memref<1x1xf32, #tpu.memory_space<smem>>
      %14 = vector.broadcast %13 : f32 to vector<1x128xf32>
      %15 = arith.addf %12, %14 : vector<1x128xf32>
      %16 = arith.negf %15 : vector<1x128xf32>
      %17 = math.exp %16 : vector<1x128xf32>
      %cst_14 = arith.constant 1.000000e+00 : f32
      %18 = vector.broadcast %cst_14 : f32 to vector<1x128xf32>
      %19 = arith.addf %18, %17 : vector<1x128xf32>
      %20 = arith.divf %18, %19 : vector<1x128xf32>
      %c0_15 = arith.constant 0 : index
      %c0_16 = arith.constant 0 : index
      %21 = vector.load %arg5[%c0_15, %c0_16] : memref<1x128xf32, #tpu.memory_space<vmem>>, vector<1x128xf32>
      tpu.vector_store %arg5[%c0_15, %c0_16], %20 {strides = array<i32>} : memref<1x128xf32, #tpu.memory_space<vmem>>, vector<1x128xf32>,
    } else {
    }
    return
  }
  func.func @transform_0(%arg0: i32, %arg1: i32) -> (i32, i32) {
    %c0_i32 = arith.constant 0 : i32
    return %arg0, %arg1 : i32, i32
  }
  func.func @transform_1(%arg0: i32, %arg1: i32) -> (i32, i32) {
    %c0_i32 = arith.constant 0 : i32
    %c0_i32_0 = arith.constant 0 : i32
    return %c0_i32, %arg1 : i32, i32
  }
  func.func @transform_2(%arg0: i32, %arg1: i32) -> (i32, i32) {
    %c0_i32 = arith.constant 0 : i32
    %c0_i32_0 = arith.constant 0 : i32
    %c0_i32_1 = arith.constant 0 : i32
    return %c0_i32, %c0_i32_0 : i32, i32
  }
  func.func @transform_3(%arg0: i32, %arg1: i32) -> (i32, i32) {
    %c0_i32 = arith.constant 0 : i32
    %c0_i32_0 = arith.constant 0 : i32
    return %c0_i32, %arg0 : i32, i32
  }
}

</mosaic_0001>

<bundles_post_ra>
// kernel: tpu_custom_call.1
= control target key start
LH: loop header
LB: loop body
LE: loop exit
PB: predicated region body
PF: predicated region fallthrough
CT: control target
= control target key end

     0   :  { %s749_s0 = inlined_call_operand.vmem [shape: f32[256,64], index: 0, kind: input, shape index: {}]   ;;  %s750_s1 = inlined_call_operand.vmem [shape: f32[1,64], index: 1, kind: input, shape index: {}]   ;;  %s751_s2 = inlined_call_operand.<no memory space> [shape: f32[1,1], index: 2, kind: input, shape index: {}]   ;;  %s752_s3 = inlined_call_operand.hbm [shape: f32[1,256], index: 3, kind: output, shape index: {}]  }
   0x1   :  { %8 = sst [smem:[#allocation3]] %s751_s2 }
   0x2   :  { %9 = vsyncpa [#allocation5], 0 }
   0x3   :  { %11 = vsyncpa [#allocation5 + $0x1], 0  ;;  %s615_s14 = smov 0   ;;  %s617_s15 = smov 0  }
   0x4   :  { %s619_s16 = smov 0   ;;  %s621_s17 = smov 0  }
   0x5   :  { %s623_s18 = smov 0   ;;  %s625_s19 = smov 0  }
   0x6 LB: > { %s423_s2 = sadd.s32 4294967295, %s589_s19   ;;  %s424_s20 = sadd.s32 4294967294, %s589_s19   ;;  %s589_s19 = sphi %s625_s19, %s17_s19   ;;  %s585_s18 = sphi %s623_s18, %s759_s18   ;;  %s581_s17 = sphi %s621_s17, %s758_s17   ;;  %s577_s16 = sphi %s619_s16, %s757_s16   ;;  %s573_s15 = sphi %s617_s15, %s756_s15   ;;  %s569_s14 = sphi %s615_s14, %s755_s14  }
   0x7   : > { %s29_s21 = sadd.s32 1, %s585_s18  ;;  %s111_s22 = sadd.s32 1, %s577_s16 }
   0x8   : > { %p31_p0 = scmp.ge.s32.totalorder %s29_s21, 2  ;;  %p121_p1 = scmp.ne.s32.totalorder %s577_s16, %s573_s15 }
   0x9   : > { %p122_p2 = scmp.eq.s32.totalorder %s423_s2, 1  ;;  %p127_p3 = scmp.ne.s32.totalorder %s573_s15, %s569_s14 }
   0xa   : > { %s761_s21 = smov (%p31_p0, %s29_s21), 0  ;;  %p128_p5 = scmp.eq.s32.totalorder %s424_s20, 1 }
   0xb   : > { %p655_p4 = por %p122_p2, %p121_p1  ;;  %s108_s24 = ssub.s32 %s585_s18, %s761_s21 }
   0xc   : > { %p428_p6 = scmp.ge.s32.totalorder %s589_s19, 1  ;;  %p109_p7 = scmp.eq.s32.totalorder %s108_s24, 0 }
   0xd   : > { %p662_p8 = por %p128_p5, %p127_p3  ;;  %p167_p9 = scmp.lt.s32.totalorder %s589_s19, 3 }
   0xe   : > { %s668_s26 = scalar_select %p109_p7, %s577_s16, %s111_s22  }
   0xf   : > { %p168_p10 = pnand %p428_p6, %p167_p9 }
  0x10   : > { %s429_s27 = sshll.u32 (!%p168_p10), %s581_s17, 4  ;;  %s309_s7 = sld [smem:[#allocation3]] (!%p168_p10) }
  0x11   : > { %171 = sbr.rel (%p168_p10) target bundleno = 258 (0x102), region = 32  ;;  %p197_p11 = scmp.lt.s32.totalorder (!%p168_p10), %s429_s27, 31 }
  0x12   : > { %s194_s8 = sand.u32 (!%p168_p10), 1, %s573_s15   ;;  %s341_s11 = scalar_lea.hbm (!%p168_p10), %s752_s3, %s581_s17 }
  0x13   : > { %s195_s12 = scalar_lea.vmem (!%p168_p10), [#allocation4], %s194_s8  ;;  %s345_s2 = sshll.u32 (!%p168_p10), %s341_s11, 4  ;;  %s346_s2 = int_to_ptr.hbm [resolvable:$true] %s345_s2 }
  0x14   : > { %s343_s13 = sshll.u32 (!%p168_p10), %s195_s12, 4  ;;  %s333_s20 = scalar_lea.sflag (!%p168_p10), [#allocation5], %s194_s8  ;;  %s344_s13 = int_to_ptr.vmem [resolvable:$true] %s343_s13 }
  0x15   : > { %s525_s17 = sshra.s32 (!%p168_p10), %s346_s2, 4  ;;  %s526_s17 = int_to_ptr.hbm [resolvable:$true] %s525_s17 }
  0x16   : > { %s763_s27 = smov (!%p197_p11, %s429_s27), 31  ;;  %vm231_vm0 = vcmask 523264   ;;  %v591_v9 = vmov 0.0   ;;  %v214_v17 = vld [vmem:[%s750_s1] sm:$0x1]  ;;  %v310_v21 = vstv %s309_s7  ;;  %s527_s22 = scalar_lea.hbm %s526_s17, 1 }
  0x17   : > { %s430_s28 = sshll.u32 %s763_s27, 3  ;;  %212 = vst [vmem:[#allocation2] sm:$0x1] %v591_v9  ;;  %p528_p12 = scmp.ne.s32.totalorder %s526_s17, %s527_s22 }
  0x18   : > { %s674_s4 = scalar_lea.vmem %s749_s0, %s430_s28  ;;  %s531_s28 = scalar_lea.hbm %s752_s3, 2 }
  0x19   : > { %v230_v0 = vld [vmem:[%s674_s4 + $0x78] sm:$0xff]  ;;  %v229_v1 = vld [vmem:[%s674_s4 + $0x70] sm:$0xff]  ;;  %v228_v2 = vld [vmem:[%s674_s4 + $0x68] sm:$0xff]  ;;  %p529_p13 = pnand %p528_p12, %p655_p4  ;;  %p532_p1 = scmp.lt.s32.totalorder %s526_s17, %s752_s3 }
  0x1a   : > { %431 = vmatpush.xpose.msk.msra.mxu0 %vm231_vm0, %v230_v0  ;;  %v227_v3 = vld [vmem:[%s674_s4 + $0x60] sm:$0xff]  ;;  %v226_v4 = vld [vmem:[%s674_s4 + $0x58] sm:$0xff]  ;;  %v225_v5 = vld [vmem:[%s674_s4 + $0x50] sm:$0xff]  ;;  %p533_p2 = scmp.lt.s32.totalorder %s531_s28, %s527_s22 }
  0x1b   : > { %v224_v6 = vld [vmem:[%s674_s4 + $0x48] sm:$0xff]  ;;  %v223_v7 = vld [vmem:[%s674_s4 + $0x40] sm:$0xff]  ;;  %v222_v8 = vld [vmem:[%s674_s4 + $0x38] sm:$0xff]  ;;  %p530_p0 = pneg %p529_p13 }
  0x1c   : > { %v221_v10 = vld [vmem:[%s674_s4 + $0x30] sm:$0xff]  ;;  %v220_v11 = vld [vmem:[%s674_s4 + $0x28] sm:$0xff]  ;;  %v219_v12 = vld [vmem:[%s674_s4 + $0x20] sm:$0xff]  ;;  %p534_p3 = por %p533_p2, %p532_p1 }
  0x1d   : > { %v218_v13 = vld [vmem:[%s674_s4 + $0x18] sm:$0xff]  ;;  %v217_v14 = vld [vmem:[%s674_s4 + $0x10] sm:$0xff]  ;;  %v216_v15 = vld [vmem:[%s674_s4 + $0x8] sm:$0xff] }
  0x1e   : > { %432 = vmatpush.xpose.msk.msra.mxu0 %vm231_vm0, %v229_v1  ;;  %v215_v16 = vld [vmem:[%s674_s4] sm:$0xff]  ;;  %p535_p5 = pnand %p534_p3, %p530_p0 }
  0x1f   : > { %v213_v18 = vld [vmem:[#allocation2] sm:$0x1] }
  0x22   : > { %433 = vmatpush.xpose.msk.msra.mxu0 %vm231_vm0, %v228_v2 }
  0x26   : > { %434 = vmatpush.xpose.msk.msra.mxu0 %vm231_vm0, %v227_v3 }
  0x2a   : > { %435 = vmatpush.xpose.msk.msra.mxu0 %vm231_vm0, %v226_v4 }
  0x2e   : > { %436 = vmatpush.xpose.msk.msra.mxu0 %vm231_vm0, %v225_v5 }
  0x32   : > { %437 = vmatpush.xpose.msk.msra.mxu0 %vm231_vm0, %v224_v6 }
  0x36   : > { %438 = vmatpush.xpose.msk.msra.mxu0 %vm231_vm0, %v223_v7 }
  0x3a   : > { %439 = vmatpush.xpose.msk.msra.mxu0 %vm231_vm0, %v222_v8 }
  0x3e   : > { %440 = vmatpush.xpose.msk.msra.mxu0 %vm231_vm0, %v221_v10 }
  0x42   : > { %441 = vmatpush.xpose.msk.msra.mxu0 %vm231_vm0, %v220_v11 }
  0x46   : > { %442 = vmatpush.xpose.msk.msra.mxu0 %vm231_vm0, %v219_v12 }
  0x4a   : > { %443 = vmatpush.xpose.msk.msra.mxu0 %vm231_vm0, %v218_v13 }
  0x4e   : > { %444 = vmatpush.xpose.msk.msra.mxu0 %vm231_vm0, %v217_v14 }
  0x52   : > { %445 = vmatpush.xpose.msk.msra.mxu0 %vm231_vm0, %v216_v15 }
  0x56   : > { %446 = vmatpush.xpose.msk.msra.mxu0 %vm231_vm0, %v215_v16 }
  0x59   : > { %447 = vmatmul.msk.f32.vlgmr.msra.gmra.mxu0 %vm231_vm0, %v214_v17 }
  0xd6   : > { %v300_v19 = vpop.f32.mrf.mxu0 }
  0xd7   : > { %v303_v20 = vadd.f32 %v300_v19, %v213_v18 }
  0xd9   : > { %304 = vst [vmem:[#allocation2] sm:$0x1] %v303_v20 }
  0xe0   : > { %v308_v22 = vld [vmem:[#allocation2] sm:$0x1] }
  0xe1   : > { %v311_v23 = vadd.f32 %v310_v21, %v308_v22 }
  0xe3   : > { %v448_v24 = vmul.f32 -1.442695, %v311_v23 }
  0xe5   : > { %507 = vpow2.f32 %v448_v24 }
  0xeb   : > { %v508_v25 = vpop.eup %507 }
  0xec   : > { %v315_v26 = vadd.f32 1.0, %v508_v25 }
  0xee   : > { %509 = vrcp.f32 %v315_v26  ;;  %v327_v30 = vand.u32 2147483648, %v315_v26  ;;  %v325_v32 = vand.u32 2147483647, %v315_v26  ;;  %vm321_vm2 = vweird.f32 %v315_v26 }
  0xf0   : > { %v328_v34 = vor.u32 1.1754944e-38, %v327_v30  ;;  %vm326_vm4 = vcmp.eq.f32.partialorder %v325_v32, 8.507059e+37 }
  0xf4   : > { %v510_v27 = vpop.eup %509 }
  0xf5   : > { %v317_v28 = vmul.f32 %v510_v27, %v315_v26  ;;  %vm322_vm1 = vweird.f32 %v510_v27 }
  0xf6   : > { %vm323_vm3 = vmor %vm321_vm2, %vm322_vm1 }
  0xf7   : > { %v318_v29 = vsub.f32 1.0, %v317_v28 }
  0xf9   : > { %v319_v31 = vmul.f32 %v510_v27, %v318_v29 }
  0xfb   : > { %v320_v33 = vadd.f32 %v510_v27, %v319_v31 }
  0xfd   : > { %v324_v35 = vsel %vm323_vm3, %v510_v27, %v320_v33 }
  0xfe   : > { %v329_v36 = vsel %vm326_vm4, %v328_v34, %v324_v35 }
  0xff   : > { %331 = vst [vmem:[%s195_s12] sm:$0x1] %v329_v36 }
 0x100   : > { %538 = shalt.err (!%p535_p5)
}
 0x101   : > { %451 = dma.vmem_to_hbm [thread:$0]  (%p655_p4), %s344_s13, 16, %s346_s2, %s333_s20  }
 0x102 PF: > { %p457_p6 = scmp.ge.s32.totalorder %s589_s19, 2  ;;  %s357_s4 = sand.u32 1, %s569_s14  }
 0x103   : > { %s358_s5 = scalar_lea.sflag [#allocation5], %s357_s4 }
 0x104   : > { %p454_p7 = pnand %p457_p6, %p662_p8 }
 0x106   : > { %p455_p9 = pneg %p454_p7 }
 0x108   : > { %564 = dma.done.wait (%p455_p9), %s358_s5, 16  }
 0x109   : > { %566 = vsyncadd (%p455_p9), %s358_s5, 4294967280  ;;  %s17_s19 = sadd.s32 1, %s589_s19   ;;  %s755_s14 = smov %s573_s15 }
 0x10a   : > { %p14_p10 = scmp.ge.s32.totalorder %s17_s19, 4   ;;  %s756_s15 = smov %s577_s16 }
 0x10b   : > { %s757_s16 = smov %s668_s26  ;;  %s758_s17 = smov %s585_s18 }
 0x10c   : > { %s759_s18 = smov %s761_s21  ;;  %16 = sbr.rel (!%p14_p10) target bundleno = 6 (0x6), region = 78 }
 0x111   :  { %363 = vsyncpa [#allocation5], 1 }
 0x112   :  { %365 = vsyncpa [#allocation5 + $0x1], 1 }

</bundles_post_ra>
